<compile_context>
chip_gen: v7x
topology: tpu7x:2x2x1
jax: 0.10.0
libtpu: 0.0.40
codegen_flags: <defaults>
</compile_context>

<pallas_src>
import jax
import jax.numpy as jnp
from jax.experimental import pallas as pl
from jax.experimental.pallas import tpu as pltpu

LANE = 128
H1_P = 128   # padded width of fc1 (logical 60)
H2_P = 128   # padded width of fc2 (logical 30)


def _round_up(x, m):
    return (x + m - 1) // m * m


def dqn_kernel(x_ref, w1_ref, b1_ref, w2_ref, b2_ref, w3_ref, b3_ref, o_ref):
    # fc1: bf16 @ bf16 -> f32 accumulate on the MXU; bias-add + ReLU in f32 on the VPU.
    h1 = jnp.dot(x_ref[...], w1_ref[...], preferred_element_type=jnp.float32)
    h1 = jnp.maximum(h1 + b1_ref[...], 0.0)
    # fc2 (cast activations to bf16 only for the MXU input; keep elementwise math in f32).
    h2 = jnp.dot(h1.astype(w2_ref.dtype), w2_ref[...],
                 preferred_element_type=jnp.float32)
    h2 = jnp.maximum(h2 + b2_ref[...], 0.0)
    # out layer (the original module applies ReLU to the Q-values, so we keep it).
    h3 = jnp.dot(h2.astype(w3_ref.dtype), w3_ref[...],
                 preferred_element_type=jnp.float32)
    h3 = jnp.maximum(h3 + b3_ref[...], 0.0)
    o_ref[...] = h3.astype(o_ref.dtype)


def deep_q_network(x, params, dim_action, *, block_batch=512):
    """x: (batch, dim_state) f32.  params: padded (in, out) weights + (1, out) biases."""
    w1 = params["w1"].astype(jnp.bfloat16)
    w2 = params["w2"].astype(jnp.bfloat16)
    w3 = params["w3"].astype(jnp.bfloat16)
    b1, b2, b3 = params["b1"], params["b2"], params["b3"]

    batch, dim_state = x.shape
    out_p = w3.shape[1]                      # padded output width (multiple of 128)

    # Batch tile: as large as requested (sweepable 512-2048), but >= batch rounded to
    # the sublane multiple of 8.  Weights (~130 KB in bf16) are VMEM-resident; the x/out
    # tiles dominate and double-buffer comfortably under the 32 MiB scoped default.
    tb = min(block_batch, _round_up(batch, 8))
    padded_batch = _round_up(batch, tb)
    x_p = x if padded_batch == batch else jnp.pad(x, ((0, padded_batch - batch), (0, 0)))
    x_p = x_p.astype(jnp.bfloat16)

    grid = (padded_batch // tb,)

    cost = pl.CostEstimate(
        flops=2 * padded_batch * (dim_state * H1_P + H1_P * H2_P + H2_P * out_p),
        transcendentals=0,
        bytes_accessed=(x_p.size * 2
                        + (w1.size + w2.size + w3.size) * 2
                        + (b1.size + b2.size + b3.size) * 4
                        + padded_batch * out_p * 4),
    )

    out = pl.pallas_call(
        dqn_kernel,
        out_shape=jax.ShapeDtypeStruct((padded_batch, out_p), jnp.float32),
        grid=grid,
        in_specs=[
            pl.BlockSpec((tb, dim_state), lambda i: (i, 0)),    # x: tiled over batch
            pl.BlockSpec((dim_state, H1_P), lambda i: (0, 0)),  # w1: resident
            pl.BlockSpec((1, H1_P), lambda i: (0, 0)),          # b1: resident
            pl.BlockSpec((H1_P, H2_P), lambda i: (0, 0)),       # w2: resident
            pl.BlockSpec((1, H2_P), lambda i: (0, 0)),          # b2: resident
            pl.BlockSpec((H2_P, out_p), lambda i: (0, 0)),      # w3: resident
            pl.BlockSpec((1, out_p), lambda i: (0, 0)),         # b3: resident
        ],
        out_specs=pl.BlockSpec((tb, out_p), lambda i: (i, 0)),
        compiler_params=pltpu.CompilerParams(
            dimension_semantics=("parallel",)),
        cost_estimate=cost,
    )(x_p, w1, b1, w2, b2, w3, b3)

    return out[:batch, :dim_action]


def init_params(key, dim_state, dim_action):
    """Mimics the PyTorch module's init (weights ~ N(0, 0.1), biases ~ nn.Linear default
    U(-1/sqrt(fan_in), 1/sqrt(fan_in))), then zero-pads the hidden/output widths to 128.
    Padded columns get zero weights AND zero biases, so ReLU keeps them at exactly 0."""
    ks = jax.random.split(key, 6)
    out_p = _round_up(max(dim_action, 1), LANE)

    def linear(kw, kb, fan_in, fan_out, pad_in, pad_out):
        w = 0.1 * jax.random.normal(kw, (fan_in, fan_out), dtype=jnp.float32)  # = torch W.T
        bound = 1.0 / jnp.sqrt(jnp.float32(fan_in))
        b = jax.random.uniform(kb, (1, fan_out), dtype=jnp.float32,
                               minval=-bound, maxval=bound)
        w = jnp.pad(w, ((0, pad_in - fan_in), (0, pad_out - fan_out)))
        b = jnp.pad(b, ((0, 0), (0, pad_out - fan_out)))
        return w, b

    w1, b1 = linear(ks[0], ks[1], dim_state, 60, dim_state, H1_P)
    w2, b2 = linear(ks[2], ks[3], 60, 30, H1_P, H2_P)
    w3, b3 = linear(ks[4], ks[5], 30, dim_action, H2_P, out_p)
    return {"w1": w1, "b1": b1, "w2": w2, "b2": b2, "w3": w3, "b3": b3}


def reference_forward(x, params, dim_action):
    """Pure-JAX reference following the exact same bf16-input / f32-accumulate path."""
    def bf16(a):
        return a.astype(jnp.bfloat16).astype(jnp.float32)

    w1, w2, w3 = bf16(params["w1"]), bf16(params["w2"]), bf16(params["w3"])
    h1 = jnp.maximum(bf16(x) @ w1 + params["b1"], 0.0)
    h2 = jnp.maximum(bf16(h1) @ w2 + params["b2"], 0.0)
    h3 = jnp.maximum(bf16(h2) @ w3 + params["b3"], 0.0)
    return h3[:, :dim_action]


if __name__ == "__main__":
    batch, dim_state, dim_action = 2, 16, 4
    key = jax.random.PRNGKey(0)
    k_x, k_p = jax.random.split(key)
    x = jax.random.normal(k_x, (batch, dim_state), dtype=jnp.float32)
    params = init_params(k_p, dim_state, dim_action)

    out = deep_q_network(x, params, dim_action)
    out = jax.block_until_ready(out)

    ref = reference_forward(x, params, dim_action)
    assert out.shape == (batch, dim_action), out.shape
    assert jnp.allclose(out, ref, atol=1e-4, rtol=1e-4), (out, ref)
    print("KERNEL_OK")
</pallas_src>

<mosaic_0001>
module attributes {stable_mosaic.version = 11 : i64} {
  func.func @dqn_kernel(%arg0: i32, %arg1: memref<8x16xbf16, #tpu.memory_space<vmem>>, %arg2: memref<16x128xbf16, #tpu.memory_space<vmem>>, %arg3: memref<1x128xf32, #tpu.memory_space<vmem>>, %arg4: memref<128x128xbf16, #tpu.memory_space<vmem>>, %arg5: memref<1x128xf32, #tpu.memory_space<vmem>>, %arg6: memref<128x128xbf16, #tpu.memory_space<vmem>>, %arg7: memref<1x128xf32, #tpu.memory_space<vmem>>, %arg8: memref<8x128xf32, #tpu.memory_space<vmem>>) attributes {dimension_semantics = [#tpu.dimension_semantics<parallel>], iteration_bounds = array<i64: 1>, scalar_prefetch = 0 : i64, scratch_operands = 0 : i64, tpu.core_type = #tpu.core_type<tc>, window_params = [{transform_indices = @transform_0, window_bounds = array<i64: 8, 16>}, {pipeline_mode = #tpu.pipeline_mode<synchronous>, transform_indices = @transform_1, window_bounds = array<i64: 16, 128>}, {pipeline_mode = #tpu.pipeline_mode<synchronous>, transform_indices = @transform_2, window_bounds = array<i64: 1, 128>}, {pipeline_mode = #tpu.pipeline_mode<synchronous>, transform_indices = @transform_3, window_bounds = array<i64: 128, 128>}, {pipeline_mode = #tpu.pipeline_mode<synchronous>, transform_indices = @transform_4, window_bounds = array<i64: 1, 128>}, {pipeline_mode = #tpu.pipeline_mode<synchronous>, transform_indices = @transform_5, window_bounds = array<i64: 128, 128>}, {pipeline_mode = #tpu.pipeline_mode<synchronous>, transform_indices = @transform_6, window_bounds = array<i64: 1, 128>}, {transform_indices = @transform_7, window_bounds = array<i64: 8, 128>}]} {
    %c0 = arith.constant 0 : index
    %c0_0 = arith.constant 0 : index
    %0 = vector.load %arg1[%c0, %c0_0] : memref<8x16xbf16, #tpu.memory_space<vmem>>, vector<8x16xbf16>
    %c0_1 = arith.constant 0 : index
    %c0_2 = arith.constant 0 : index
    %1 = vector.load %arg2[%c0_1, %c0_2] : memref<16x128xbf16, #tpu.memory_space<vmem>>, vector<16x128xbf16>
    %cst = arith.constant dense<0.000000e+00> : vector<8x128xf32>
    %2 = tpu.matmul %0, %1, %cst {dimension_numbers = #tpu.dot_dimension_numbers<[1], [0], [0], [1], [0, 0, 1, 1], [], []>} : vector<8x16xbf16>, vector<16x128xbf16>, vector<8x128xf32> -> vector<8x128xf32>
    %c0_3 = arith.constant 0 : index
    %c0_4 = arith.constant 0 : index
    %3 = vector.load %arg3[%c0_3, %c0_4] : memref<1x128xf32, #tpu.memory_space<vmem>>, vector<1x128xf32>
    %4 = vector.broadcast %3 : vector<1x128xf32> to vector<8x128xf32>
    %5 = arith.addf %2, %4 : vector<8x128xf32>
    %cst_5 = arith.constant 0.000000e+00 : f32
    %6 = vector.broadcast %cst_5 : f32 to vector<8x128xf32>
    %7 = arith.maximumf %5, %6 : vector<8x128xf32>
    %8 = arith.truncf %7 : vector<8x128xf32> to vector<8x128xbf16>
    %c0_6 = arith.constant 0 : index
    %c0_7 = arith.constant 0 : index
    %9 = vector.load %arg4[%c0_6, %c0_7] : memref<128x128xbf16, #tpu.memory_space<vmem>>, vector<128x128xbf16>
    %cst_8 = arith.constant dense<0.000000e+00> : vector<8x128xf32>
    %10 = tpu.matmul %8, %9, %cst_8 {dimension_numbers = #tpu.dot_dimension_numbers<[1], [0], [0], [1], [0, 0, 1, 1], [], []>} : vector<8x128xbf16>, vector<128x128xbf16>, vector<8x128xf32> -> vector<8x128xf32>
    %c0_9 = arith.constant 0 : index
    %c0_10 = arith.constant 0 : index
    %11 = vector.load %arg5[%c0_9, %c0_10] : memref<1x128xf32, #tpu.memory_space<vmem>>, vector<1x128xf32>
    %12 = vector.broadcast %11 : vector<1x128xf32> to vector<8x128xf32>
    %13 = arith.addf %10, %12 : vector<8x128xf32>
    %cst_11 = arith.constant 0.000000e+00 : f32
    %14 = vector.broadcast %cst_11 : f32 to vector<8x128xf32>
    %15 = arith.maximumf %13, %14 : vector<8x128xf32>
    %16 = arith.truncf %15 : vector<8x128xf32> to vector<8x128xbf16>
    %c0_12 = arith.constant 0 : index
    %c0_13 = arith.constant 0 : index
    %17 = vector.load %arg6[%c0_12, %c0_13] : memref<128x128xbf16, #tpu.memory_space<vmem>>, vector<128x128xbf16>
    %cst_14 = arith.constant dense<0.000000e+00> : vector<8x128xf32>
    %18 = tpu.matmul %16, %17, %cst_14 {dimension_numbers = #tpu.dot_dimension_numbers<[1], [0], [0], [1], [0, 0, 1, 1], [], []>} : vector<8x128xbf16>, vector<128x128xbf16>, vector<8x128xf32> -> vector<8x128xf32>
    %c0_15 = arith.constant 0 : index
    %c0_16 = arith.constant 0 : index
    %19 = vector.load %arg7[%c0_15, %c0_16] : memref<1x128xf32, #tpu.memory_space<vmem>>, vector<1x128xf32>
    %20 = vector.broadcast %19 : vector<1x128xf32> to vector<8x128xf32>
    %21 = arith.addf %18, %20 : vector<8x128xf32>
    %cst_17 = arith.constant 0.000000e+00 : f32
    %22 = vector.broadcast %cst_17 : f32 to vector<8x128xf32>
    %23 = arith.maximumf %21, %22 : vector<8x128xf32>
    %c0_18 = arith.constant 0 : index
    %c0_19 = arith.constant 0 : index
    %24 = vector.load %arg8[%c0_18, %c0_19] : memref<8x128xf32, #tpu.memory_space<vmem>>, vector<8x128xf32>
    tpu.vector_store %arg8[%c0_18, %c0_19], %23 {strides = array<i32>} : memref<8x128xf32, #tpu.memory_space<vmem>>, vector<8x128xf32>,
    return
  }
  func.func @transform_0(%arg0: i32) -> (i32, i32) {
    %c0_i32 = arith.constant 0 : i32
    %c0_i32_0 = arith.constant 0 : i32
    return %arg0, %c0_i32 : i32, i32
  }
  func.func @transform_1(%arg0: i32) -> (i32, i32) {
    %c0_i32 = arith.constant 0 : i32
    %c0_i32_0 = arith.constant 0 : i32
    %c0_i32_1 = arith.constant 0 : i32
    return %c0_i32, %c0_i32_0 : i32, i32
  }
  func.func @transform_2(%arg0: i32) -> (i32, i32) {
    %c0_i32 = arith.constant 0 : i32
    %c0_i32_0 = arith.constant 0 : i32
    %c0_i32_1 = arith.constant 0 : i32
    return %c0_i32, %c0_i32_0 : i32, i32
  }
  func.func @transform_3(%arg0: i32) -> (i32, i32) {
    %c0_i32 = arith.constant 0 : i32
    %c0_i32_0 = arith.constant 0 : i32
    %c0_i32_1 = arith.constant 0 : i32
    return %c0_i32, %c0_i32_0 : i32, i32
  }
  func.func @transform_4(%arg0: i32) -> (i32, i32) {
    %c0_i32 = arith.constant 0 : i32
    %c0_i32_0 = arith.constant 0 : i32
    %c0_i32_1 = arith.constant 0 : i32
    return %c0_i32, %c0_i32_0 : i32, i32
  }
  func.func @transform_5(%arg0: i32) -> (i32, i32) {
    %c0_i32 = arith.constant 0 : i32
    %c0_i32_0 = arith.constant 0 : i32
    %c0_i32_1 = arith.constant 0 : i32
    return %c0_i32, %c0_i32_0 : i32, i32
  }
  func.func @transform_6(%arg0: i32) -> (i32, i32) {
    %c0_i32 = arith.constant 0 : i32
    %c0_i32_0 = arith.constant 0 : i32
    %c0_i32_1 = arith.constant 0 : i32
    return %c0_i32, %c0_i32_0 : i32, i32
  }
  func.func @transform_7(%arg0: i32) -> (i32, i32) {
    %c0_i32 = arith.constant 0 : i32
    %c0_i32_0 = arith.constant 0 : i32
    return %arg0, %c0_i32 : i32, i32
  }
}

</mosaic_0001>

<bundles_post_ra>
// kernel: tpu_custom_call.1
= control target key start
LH: loop header
LB: loop body
LE: loop exit
PB: predicated region body
PF: predicated region fallthrough
CT: control target
= control target key end

     0   :  { %12 = vsyncpa [#allocation3], 0  ;;  %s764_s0 = inlined_call_operand.hbm [shape: bf16[8,16], index: 0, kind: input, shape index: {}]   ;;  %s765_s1 = inlined_call_operand.hbm [shape: bf16[16,128], index: 1, kind: input, shape index: {}]   ;;  %s766_s2 = inlined_call_operand.vmem [shape: f32[1,128], index: 2, kind: input, shape index: {}]   ;;  %s767_s3 = inlined_call_operand.hbm [shape: bf16[128,128], index: 3, kind: input, shape index: {}]   ;;  %s768_s4 = inlined_call_operand.vmem [shape: f32[1,128], index: 4, kind: input, shape index: {}]   ;;  %s769_s5 = inlined_call_operand.hbm [shape: bf16[128,128], index: 5, kind: input, shape index: {}]   ;;  %s770_s6 = inlined_call_operand.vmem [shape: f32[1,128], index: 6, kind: input, shape index: {}]   ;;  %s771_s7 = inlined_call_operand.hbm [shape: f32[8,128], index: 7, kind: output, shape index: {}]  }
   0x1   :  { %13 = vsyncpa [#allocation6], 0 }
   0x2   :  { %14 = vsyncpa [#allocation9], 0 }
   0x3   :  { %15 = vsyncpa [#allocation4], 0  ;;  %s617_s24 = smov [#allocation5]   ;;  %s499_s28 = scalar_lea.hbm %s765_s1, 128 }
   0x4   :  { %s31_s25 = sshll.u32 %s617_s24, 4  ;;  %p500_p0 = scmp.ne.s32.totalorder %s765_s1, %s499_s28  ;;  %s32_s25 = int_to_ptr.vmem [resolvable:$true] %s31_s25 }
   0x5   :  { %p503_p1 = scmp.lt.u32.totalorder %s499_s28, %s765_s1 }
   0x7   :  { %p505_p2 = pnand %p503_p1, %p500_p0 }
   0x9   :  { %508 = shalt.err (!%p505_p2)
}
   0xa   :  { %s509_s10 = scalar_lea.vmem %s32_s25, 128  ;;  %p514_p4 = scmp.lt.s32.totalorder %s32_s25, %s32_s25 }
   0xb   :  { %p510_p3 = scmp.ne.s32.totalorder %s32_s25, %s509_s10  ;;  %p515_p5 = scmp.lt.s32.totalorder %s509_s10, %s509_s10 }
   0xd   :  { %p516_p6 = por %p515_p5, %p514_p4 }
   0xf   :  { %p517_p7 = pnand %p516_p6, %p510_p3 }
  0x11   :  { %520 = shalt.err (!%p517_p7)
}
  0x12   :  { %s618_s11 = smov 64   ;;  %s619_s12 = smov 4  }
  0x13   :  { %37 = dma.hbm_to_vmem [thread:$0]  %s765_s1, 128, %s32_s25, [#allocation6], %s618_s11, %s618_s11, %s619_s12  }
  0x14   :  { %s620_s15 = smov [#allocation2]   ;;  %s621_s17 = smov [#allocation7]  }
  0x15   :  { %s22_s16 = sshll.u32 %s620_s15, 4  ;;  %s45_s18 = sshll.u32 %s621_s17, 4  ;;  %s23_s16 = int_to_ptr.vmem [resolvable:$true] %s22_s16  ;;  %s46_s18 = int_to_ptr.vmem [resolvable:$true] %s45_s18 }
  0x16   :  { %s521_s21 = scalar_lea.hbm %s764_s0, 64 }
  0x17   :  { %p522_p8 = scmp.ne.s32.totalorder %s764_s0, %s521_s21  ;;  %p525_p9 = scmp.lt.u32.totalorder %s521_s21, %s764_s0 }
  0x19   :  { %p527_p10 = pnand %p525_p9, %p522_p8 }
  0x1b   :  { %530 = shalt.err (!%p527_p10)
}
  0x1c   :  { %s531_s1 = scalar_lea.vmem %s23_s16, 64  ;;  %p536_p12 = scmp.lt.s32.totalorder %s23_s16, %s23_s16 }
  0x1d   :  { %p532_p11 = scmp.ne.s32.totalorder %s23_s16, %s531_s1  ;;  %p537_p13 = scmp.lt.s32.totalorder %s531_s1, %s531_s1 }
  0x1f   :  { %p538_p0 = por %p537_p13, %p536_p12 }
  0x21   :  { %p539_p1 = pnand %p538_p0, %p532_p11 }
  0x23   :  { %542 = shalt.err (!%p539_p1)
}
  0x24   :  { %25 = dma.hbm_to_vmem [thread:$0]  %s764_s0, 64, %s23_s16, [#allocation3]  }
  0x25   :  { %s543_s30 = scalar_lea.hbm %s767_s3, 1024 }
  0x26   :  { %p544_p2 = scmp.ne.s32.totalorder %s767_s3, %s543_s30  ;;  %p547_p3 = scmp.lt.u32.totalorder %s543_s30, %s767_s3 }
  0x28   :  { %p549_p4 = pnand %p547_p3, %p544_p2 }
  0x2a   :  { %552 = shalt.err (!%p549_p4)
}
  0x2b   :  { %s553_s14 = scalar_lea.vmem %s46_s18, 1024  ;;  %p558_p6 = scmp.lt.s32.totalorder %s46_s18, %s46_s18 }
  0x2c   :  { %p554_p5 = scmp.ne.s32.totalorder %s46_s18, %s553_s14  ;;  %p559_p7 = scmp.lt.s32.totalorder %s553_s14, %s553_s14 }
  0x2e   :  { %p560_p8 = por %p559_p7, %p558_p6 }
  0x30   :  { %p561_p9 = pnand %p560_p8, %p554_p5 }
  0x32   :  { %564 = shalt.err (!%p561_p9)
}
  0x33   :  { %51 = dma.hbm_to_vmem [thread:$0]  %s767_s3, 1024, %s46_s18, [#allocation6], %s618_s11, %s618_s11, %s619_s12  }
  0x34   :  { %s622_s16 = smov [#allocation8]   ;;  %s565_s21 = scalar_lea.hbm %s769_s5, 1024 }
  0x35   :  { %s59_s17 = sshll.u32 %s622_s16, 4  ;;  %p566_p10 = scmp.ne.s32.totalorder %s769_s5, %s565_s21  ;;  %s60_s17 = int_to_ptr.vmem [resolvable:$true] %s59_s17 }
  0x36   :  { %p569_p11 = scmp.lt.u32.totalorder %s565_s21, %s769_s5 }
  0x38   :  { %p571_p12 = pnand %p569_p11, %p566_p10 }
  0x3a   :  { %574 = shalt.err (!%p571_p12)
}
  0x3b   :  { %s575_s1 = scalar_lea.vmem %s60_s17, 1024  ;;  %p580_p0 = scmp.lt.s32.totalorder %s60_s17, %s60_s17 }
  0x3c   :  { %p576_p13 = scmp.ne.s32.totalorder %s60_s17, %s575_s1  ;;  %p581_p1 = scmp.lt.s32.totalorder %s575_s1, %s575_s1 }
  0x3e   :  { %p582_p2 = por %p581_p1, %p580_p0 }
  0x40   :  { %p583_p3 = pnand %p582_p2, %p576_p13 }
  0x42   :  { %586 = shalt.err (!%p583_p3)
}
  0x43   :  { %65 = dma.hbm_to_vmem [thread:$0]  %s769_s5, 1024, %s60_s17, [#allocation9], %s618_s11, %s618_s11, %s619_s12  }
  0x44   :  { %609 = dma.done.wait [#allocation3], 64  }
  0x45   :  { %610 = vsyncadd [#allocation3], 4294967232 }
  0x46   :  { %611 = dma.done.wait [#allocation6], 1152  }
  0x47   :  { %612 = vsyncadd [#allocation6], 4294966144 }
  0x48   :  { %613 = dma.done.wait [#allocation9], 1024  }
  0x49   :  { %614 = vsyncadd [#allocation9], 4294966272  ;;  %v623_v0 = vmov 0.0   ;;  %vm624_vm0 = vmmov 0   ;;  %v482_v1 = vld [vmem:[#allocation5] sm:$0xff]   ;;  %vm97_vm1 = vcmask 130048  }
  0x4a   :  { %427 = vmatprep.subr.bf16.mxu0 %v623_v0  ;;  %429 = vmatprep.mubr.msk.bf16.mxu0 %vm624_vm0, %v623_v0  ;;  %v81_v2 = vld [vmem:[#allocation2] sm:$0xf]  ;;  %v483_v3 = vld [vmem:[#allocation7] sm:$0xff]   ;;  %v484_v4 = vld [vmem:[#allocation7 + $0x8] sm:$0xff]   ;;  %s625_s28 = smov [#allocation10]  }
  0x4b   :  { %433 = vmatprep.subr.bf16.mxu1 %v623_v0  ;;  %449 = vmatprep.mubr.msk.bf16.mxu1 %vm624_vm0, %v623_v0  ;;  %v485_v5 = vld [vmem:[#allocation7 + $0x10] sm:$0xff]   ;;  %v486_v6 = vld [vmem:[#allocation7 + $0x18] sm:$0xff]   ;;  %v487_v7 = vld [vmem:[#allocation7 + $0x20] sm:$0xff]   ;;  %s375_s29 = sshll.u32 %s625_s28, 4  ;;  %s376_s29 = int_to_ptr.vmem [resolvable:$true] %s375_s29 }
  0x4c   :  { %428 = vmatpush3.bf16.msra.mxu0 %v482_v1  ;;  %434 = vmatpush3.bf16.msra.mxu1 %v483_v3  ;;  %v488_v8 = vld [vmem:[#allocation7 + $0x28] sm:$0xff]   ;;  %v489_v9 = vld [vmem:[#allocation7 + $0x30] sm:$0xff]   ;;  %v490_v10 = vld [vmem:[#allocation7 + $0x38] sm:$0xff]   ;;  %p592_p5 = scmp.lt.s32.totalorder %s376_s29, %s376_s29 }
  0x4d   :  { %453 = vmatprep.subr.bf16.mxu0 %v623_v0  ;;  %435 = vmatprep.subr.bf16.mxu1 %v623_v0  ;;  %v491_v11 = vld [vmem:[#allocation8] sm:$0xff]   ;;  %v492_v12 = vld [vmem:[#allocation8 + $0x8] sm:$0xff]   ;;  %v493_v13 = vld [vmem:[#allocation8 + $0x10] sm:$0xff]  }
  0x4e   :  { %v494_v14 = vld [vmem:[#allocation8 + $0x18] sm:$0xff]   ;;  %v495_v15 = vld [vmem:[#allocation8 + $0x20] sm:$0xff]   ;;  %v496_v16 = vld [vmem:[#allocation8 + $0x28] sm:$0xff]  }
  0x4f   :  { %430 = vmatmul.mubr.msk.bf16.vlgmr.msra.gmra.mrb[0].mxu0 %vm97_vm1, %v81_v2  ;;  %v386_v17 = vld [vmem:[%s766_s2] ss:$0 sm:$0xff]  ;;  %v498_v26 = vld [vmem:[#allocation8 + $0x38] sm:$0xff]  }
  0x50   :  { %469 = vmatprep.mubr.msk.bf16.mxu0 %vm624_vm0, %v623_v0  ;;  %436 = vmatpush3.bf16.msra.mxu1 %v484_v4  ;;  %v497_v25 = vld [vmem:[#allocation8 + $0x30] sm:$0xff]  }
  0x51   :  { %437 = vmatprep.subr.bf16.mxu1 %v623_v0  ;;  %454 = vmatpush3.bf16.msra.mxu0 %v491_v11  ;;  %v389_v27 = vld [vmem:[%s768_s4] ss:$0 sm:$0xff]  ;;  %s587_s4 = scalar_lea.vmem %s376_s29, 128 }
  0x52   :  { %455 = vmatprep.subr.bf16.mxu0 %v623_v0  ;;  %v398_v35 = vld [vmem:[%s770_s6] ss:$0 sm:$0xff]  ;;  %p588_p4 = scmp.ne.s32.totalorder %s376_s29, %s587_s4  ;;  %p593_p6 = scmp.lt.s32.totalorder %s587_s4, %s587_s4 }
  0x54   :  { %438 = vmatpush3.bf16.msra.mxu1 %v485_v5  ;;  %p594_p7 = por %p593_p6, %p592_p5 }
  0x55   :  { %439 = vmatprep.subr.bf16.mxu1 %v623_v0  ;;  %456 = vmatpush3.bf16.msra.mxu0 %v492_v12 }
  0x56   :  { %457 = vmatprep.subr.bf16.mxu0 %v623_v0  ;;  %p595_p8 = pnand %p594_p7, %p588_p4 }
  0x58   :  { %440 = vmatpush3.bf16.msra.mxu1 %v486_v6 }
  0x59   :  { %441 = vmatprep.subr.bf16.mxu1 %v623_v0  ;;  %458 = vmatpush3.bf16.msra.mxu0 %v493_v13 }
  0x5a   :  { %459 = vmatprep.subr.bf16.mxu0 %v623_v0 }
  0x5c   :  { %442 = vmatpush3.bf16.msra.mxu1 %v487_v7 }
  0x5d   :  { %443 = vmatprep.subr.bf16.mxu1 %v623_v0  ;;  %460 = vmatpush3.bf16.msra.mxu0 %v494_v14 }
  0x5e   :  { %461 = vmatprep.subr.bf16.mxu0 %v623_v0 }
  0x60   :  { %444 = vmatpush3.bf16.msra.mxu1 %v488_v8 }
  0x61   :  { %445 = vmatprep.subr.bf16.mxu1 %v623_v0  ;;  %462 = vmatpush3.bf16.msra.mxu0 %v495_v15 }
  0x62   :  { %463 = vmatprep.subr.bf16.mxu0 %v623_v0 }
  0x64   :  { %446 = vmatpush3.bf16.msra.mxu1 %v489_v9 }
  0x65   :  { %447 = vmatprep.subr.bf16.mxu1 %v623_v0  ;;  %464 = vmatpush3.bf16.msra.mxu0 %v496_v16 }
  0x66   :  { %465 = vmatprep.subr.bf16.mxu0 %v623_v0 }
  0x68   :  { %448 = vmatpush3.bf16.msra.mxu1 %v490_v10 }
  0x69   :  { %466 = vmatpush3.bf16.msra.mxu0 %v497_v25 }
  0x6a   :  { %467 = vmatprep.subr.bf16.mxu0 %v623_v0 }
  0x6d   :  { %468 = vmatpush3.bf16.msra.mxu0 %v498_v26 }
 0x122   :  { %v135_v18 = vpop.f32.mrb[0].mxu0 }
 0x123   :  { %v136_v19 = vadd.f32 %v386_v17, %v135_v18  ;;  %v431_v20 = vpop.f32.mrb[1].mxu0 }
 0x124   :  { %v138_v21 = vpop.f32.mrb[2].mxu0 }
 0x125   :  { %v141_v22 = vmax.f32 %v136_v19, 0.0  ;;  %v432_v23 = vpop.f32.mrb[3].mxu0 }
 0x127   :  { %v142_v24 = vpack.c.bf16 %v141_v22, %v141_v22 }
 0x129   :  { %450 = vmatmul.mubr.bf16.vlgmr.msra.gmra.mrb[0].mxu1 %v142_v24 }
 0x1fc   :  { %v248_v28 = vpop.f32.mrb[0].mxu1 }
 0x1fd   :  { %v249_v29 = vadd.f32 %v389_v27, %v248_v28  ;;  %v451_v30 = vpop.f32.mrb[1].mxu1 }
 0x1fe   :  { %v251_v31 = vpop.f32.mrb[2].mxu1 }
 0x1ff   :  { %v254_v32 = vmax.f32 %v249_v29, 0.0  ;;  %v452_v33 = vpop.f32.mrb[3].mxu1 }
 0x201   :  { %v255_v34 = vpack.c.bf16 %v254_v32, %v254_v32 }
 0x203   :  { %470 = vmatmul.mubr.bf16.vlgmr.msra.gmra.mrb[4].mxu0 %v255_v34 }
 0x2d6   :  { %v361_v36 = vpop.f32.mrb[4].mxu0 }
 0x2d7   :  { %v362_v37 = vadd.f32 %v398_v35, %v361_v36  ;;  %v471_v38 = vpop.f32.mrb[5].mxu0 }
 0x2d8   :  { %v364_v39 = vpop.f32.mrb[6].mxu0 }
 0x2d9   :  { %v367_v40 = vmax.f32 %v362_v37, 0.0  ;;  %v472_v41 = vpop.f32.mrb[7].mxu0 }
 0x2db   :  { %368 = vst [vmem:[#allocation10] sm:$0xff] %v367_v40 }
 0x2dc   :  { %598 = shalt.err (!%p595_p8)
}
 0x2dd   :  { %s599_s6 = scalar_lea.hbm %s771_s7, 128 }
 0x2de   :  { %p600_p9 = scmp.ne.s32.totalorder %s771_s7, %s599_s6  ;;  %p603_p10 = scmp.lt.u32.totalorder %s599_s6, %s771_s7 }
 0x2e0   :  { %p605_p11 = pnand %p603_p10, %p600_p9 }
 0x2e2   :  { %608 = shalt.err (!%p605_p11)
}
 0x2e3   :  { %378 = dma.vmem_to_hbm [thread:$0]  %s376_s29, 128, %s771_s7, [#allocation4]  }
 0x2e4   :  { %615 = dma.done.wait [#allocation4], 128  }
 0x2e5   :  { %616 = vsyncadd [#allocation4], 4294967168 }
 0x2e6   :  { %382 = vsyncpa [#allocation3], 1 }
 0x2e7   :  { %383 = vsyncpa [#allocation6], 1 }
 0x2e8   :  { %384 = vsyncpa [#allocation9], 1 }
 0x2e9   :  { %385 = vsyncpa [#allocation4], 1 }

</bundles_post_ra>
